<compile_context>
chip_gen: v6e
topology: v6e:2x2x1
jax: 0.10.0
libtpu: 0.0.40
codegen_flags: <defaults>
</compile_context>

<pallas_src>
import math

import jax
import jax.numpy as jnp
from jax import lax
from jax.experimental import pallas as pl
from jax.experimental.pallas import tpu as pltpu


# Scoped-VMEM ceiling.  Actual per-kernel use is well below this; 48 MiB is
# safe on v5e/v6e (128 MiB physical) and v7x (64 MiB per TensorCore).
_VMEM_LIMIT = 48 * 1024 * 1024


# ----------------------------------------------------------------------------
# Tile helpers
# ----------------------------------------------------------------------------
def _pick_tile(dim, target, align):
    """Largest tile <= target that divides `dim` and is a multiple of `align`;
    falls back to the full dimension (always a legal block)."""
    if dim <= target:
        return dim
    t = (target // align) * align
    while t >= align:
        if dim % t == 0:
            return t
        t -= align
    return dim


_MATMUL_TILES = None


def _matmul_tiles():
    """Generation-aware projection tile targets (tm, tn, tk)."""
    global _MATMUL_TILES
    if _MATMUL_TILES is None:
        try:
            vmem = pltpu.get_tpu_info().vmem_capacity_bytes
        except Exception:
            vmem = 64 << 20
        if vmem >= (100 << 20):            # v5e / v6e: 128 MiB VMEM
            _MATMUL_TILES = (1024, 1024, 512)
        else:                              # v7x (64 MiB per TC) / unknown
            _MATMUL_TILES = (1024, 512, 512)
    return _MATMUL_TILES


# ----------------------------------------------------------------------------
# Tiled linear kernels: x[M,K] @ w[N,K]^T (+ bias) with fp32 accumulation.
# Grid = (M/tm, N/tn, K/tk); K is the ("arbitrary") reduction axis.
# ----------------------------------------------------------------------------
def _make_linear_kernel(has_bias, acc_in_out):
    if acc_in_out:
        # f32 output: accumulate directly into the VMEM-resident output block
        # (saves tm*tn*4 B of scratch and a full-tile copy per output block).
        def kernel(*refs):
            if has_bias:
                x_ref, w_ref, b_ref, o_ref = refs
            else:
                x_ref, w_ref, o_ref = refs

            @pl.when(pl.program_id(2) == 0)
            def _():
                if has_bias:
                    o_ref[...] = jnp.broadcast_to(b_ref[...], o_ref.shape)
                else:
                    o_ref[...] = jnp.zeros_like(o_ref)

            o_ref[...] += lax.dot_general(
                x_ref[...], w_ref[...], (((1,), (1,)), ((), ())),
                preferred_element_type=jnp.float32)
    else:
        # Narrow output dtype: keep an fp32 scratch accumulator.
        def kernel(*refs):
            if has_bias:
                x_ref, w_ref, b_ref, o_ref, acc_ref = refs
            else:
                x_ref, w_ref, o_ref, acc_ref = refs

            @pl.when(pl.program_id(2) == 0)
            def _():
                acc_ref[...] = jnp.zeros_like(acc_ref)

            acc_ref[...] += lax.dot_general(
                x_ref[...], w_ref[...], (((1,), (1,)), ((), ())),
                preferred_element_type=jnp.float32)

            @pl.when(pl.program_id(2) == pl.num_programs(2) - 1)
            def _():
                res = acc_ref[...]
                if has_bias:
                    res = res + b_ref[...]
                o_ref[...] = res.astype(o_ref.dtype)

    return kernel


def linear_pallas(x2d, w, bias=None):
    """x2d: [M, K], w: [N, K] (PyTorch layout), bias: [N] or None -> [M, N]."""
    M, K = x2d.shape
    N, K2 = w.shape
    assert K == K2

    dtm, dtn, dtk = _matmul_tiles()
    sub_align = 16 if x2d.dtype == jnp.bfloat16 else 8
    tm = _pick_tile(M, dtm, sub_align)   # sublane dim of x / out blocks
    tn = _pick_tile(N, dtn, 128)         # lane dim of out / bias blocks
    tk = _pick_tile(K, dtk, 128)         # lane dim of x / w blocks
    grid = (M // tm, N // tn, K // tk)

    has_bias = bias is not None
    acc_in_out = x2d.dtype == jnp.float32
    kernel = _make_linear_kernel(has_bias, acc_in_out)

    itemsize = jnp.dtype(x2d.dtype).itemsize
    cost = pl.CostEstimate(
        flops=2 * M * N * K,
        transcendentals=0,
        # Count output-stationary re-reads of x and w (advisory).
        bytes_accessed=(M * K * (N // tn) + N * K * (M // tm) + M * N) * itemsize)

    x_spec = pl.BlockSpec((tm, tk), lambda i, j, k: (i, k))
    w_spec = pl.BlockSpec((tn, tk), lambda i, j, k: (j, k))
    in_specs = [x_spec, w_spec]
    args = [x2d, w]
    if has_bias:
        in_specs.append(pl.BlockSpec((1, tn), lambda i, j, k: (0, j)))
        args.append(bias.reshape(1, N))

    scratch = [] if acc_in_out else [pltpu.VMEM((tm, tn), jnp.float32)]

    return pl.pallas_call(
        kernel,
        out_shape=jax.ShapeDtypeStruct((M, N), x2d.dtype),
        grid=grid,
        in_specs=in_specs,
        out_specs=pl.BlockSpec((tm, tn), lambda i, j, k: (i, j)),
        scratch_shapes=scratch,
        compiler_params=pltpu.CompilerParams(
            dimension_semantics=("parallel", "parallel", "arbitrary"),
            vmem_limit_bytes=_VMEM_LIMIT),
        cost_estimate=cost,
    )(*args)


# ----------------------------------------------------------------------------
# Flash-style core attention kernel (shared body, 2-D q/k/v/mask/out refs).
# ----------------------------------------------------------------------------
def _make_flash_kernel(scale, tq, tk, causal, has_mask):
    def kernel(*refs):
        if has_mask:
            q_ref, k_ref, v_ref, m_ref, o_ref, m_sc, l_sc, acc_sc = refs
        else:
            q_ref, k_ref, v_ref, o_ref, m_sc, l_sc, acc_sc = refs
            m_ref = None

        qi = pl.program_id(1)
        kv = pl.program_id(2)

        @pl.when(kv == 0)
        def _():
            m_sc[...] = jnp.full_like(m_sc, -jnp.inf)
            l_sc[...] = jnp.zeros_like(l_sc)
            acc_sc[...] = jnp.zeros_like(acc_sc)

        def step():
            # Fold the softmax scale into q (tq*hd multiply, not tq*tk).
            q = q_ref[...] * scale                       # [tq, hd]
            k = k_ref[...]                               # [tk, hd]
            v = v_ref[...]                               # [tk, hd]

            # Contract on head_dim of both operands (no XLU transpose).
            s = lax.dot_general(q, k, (((1,), (1,)), ((), ())),
                                preferred_element_type=jnp.float32)
            if has_mask:
                s = jnp.where(m_ref[...] != 0, jnp.float32(-10000.0), s)
            if causal:
                rows = qi * tq + lax.broadcasted_iota(jnp.int32, (tq, tk), 0)
                cols = kv * tk + lax.broadcasted_iota(jnp.int32, (tq, tk), 1)
                s = jnp.where(cols > rows, jnp.float32(-10000.0), s)

            m_prev = m_sc[...]
            m_new = jnp.maximum(m_prev, jnp.max(s, axis=-1, keepdims=True))
            alpha = jnp.exp(m_prev - m_new)
            p = jnp.exp(s - m_new)
            l_sc[...] = alpha * l_sc[...] + jnp.sum(p, axis=-1, keepdims=True)
            acc_sc[...] = alpha * acc_sc[...] + lax.dot_general(
                p.astype(v.dtype), v, (((1,), (0,)), ((), ())),
                preferred_element_type=jnp.float32)
            m_sc[...] = m_new

        if causal:
            # Skip kv blocks entirely above the diagonal (DMAs for those
            # blocks are also skipped: index_maps are clamped to the diagonal).
            @pl.when(kv * tk <= qi * tq + (tq - 1))
            def _():
                step()
        else:
            step()

        @pl.when(kv == pl.num_programs(2) - 1)
        def _():
            # Exact division (negligible cost, full fp32 parity).
            o_ref[...] = (acc_sc[...] / l_sc[...]).astype(o_ref.dtype)

    return kernel


def _flash_common(S, HD, tq, tk, kernel, in_specs, args, out_shape, out_spec,
                  itemsize, bh_total, has_mask, batch):
    cost = pl.CostEstimate(
        flops=4 * bh_total * S * S * HD,
        transcendentals=bh_total * S * S,
        bytes_accessed=int(bh_total * S * HD * (2 + 2 * (S // tq)) * itemsize
                           + (bh_total * S * S if has_mask else 0)))
    return pl.pallas_call(
        kernel,
        out_shape=out_shape,
        grid=(bh_total, S // tq, S // tk),
        in_specs=in_specs,
        out_specs=out_spec,
        scratch_shapes=[pltpu.VMEM((tq, 1), jnp.float32),    # running max
                        pltpu.VMEM((tq, 1), jnp.float32),    # running denom
                        pltpu.VMEM((tq, HD), jnp.float32)],  # running context
        compiler_params=pltpu.CompilerParams(
            dimension_semantics=("parallel", "parallel", "arbitrary"),
            vmem_limit_bytes=_VMEM_LIMIT),
        cost_estimate=cost,
    )(*args)


def _flash_attention_fused(mixed2d, batch, seq, num_heads, head_dim, scale,
                           mask_i8, causal, tq=512, tk=256):
    """Fused-layout path (head_dim % 128 == 0).

    mixed2d: [s*b, nh*3*hd] QKV-projection output (per-row layout (nh, 3, hd)).
    Returns ctx2d: [s*b, nh*hd] (seq-major rows) — both layout changes are
    absorbed into BlockSpec index_maps, no wrapper transposes."""
    S, B, NH, HD = seq, batch, num_heads, head_dim
    tq = _pick_tile(S, tq, 8)
    tk = _pick_tile(S, tk, 128)
    has_mask = mask_i8 is not None

    # Zero-copy view: row si, col = bi*3*nh*hd + hi*3*hd + c*hd + d.
    x = mixed2d.reshape(S, B * 3 * NH * HD)
    kernel = _make_flash_kernel(scale, tq, tk, causal, has_mask)

    def qkv_col(bh, c):
        return (bh // NH) * 3 * NH + (bh % NH) * 3 + c

    def kv_row(qi, ki):
        if causal:
            # Clamp above-diagonal kv blocks to the diagonal block so the
            # pipeline skips their DMA (compute is skipped via pl.when).
            return jnp.minimum(ki, (qi * tq + tq - 1) // tk)
        return ki

    in_specs = [
        pl.BlockSpec((tq, HD), lambda bh, qi, ki: (qi, qkv_col(bh, 0))),
        pl.BlockSpec((tk, HD), lambda bh, qi, ki: (kv_row(qi, ki), qkv_col(bh, 1))),
        pl.BlockSpec((tk, HD), lambda bh, qi, ki: (kv_row(qi, ki), qkv_col(bh, 2))),
    ]
    args = [x, x, x]
    if has_mask:
        in_specs.append(pl.BlockSpec((None, None, tq, tk),
                                     lambda bh, qi, ki: (bh // NH, 0, qi, ki)))
        args.append(mask_i8)

    # Output written directly as [s, b*nh*hd] (lane-dense hd=128 blocks).
    out = _flash_common(
        S, HD, tq, tk, kernel, in_specs, args,
        jax.ShapeDtypeStruct((S, B * NH * HD), mixed2d.dtype),
        pl.BlockSpec((tq, HD), lambda bh, qi, ki: (qi, bh)),
        jnp.dtype(mixed2d.dtype).itemsize, B * NH, has_mask, B)
    return out.reshape(S * B, NH * HD)           # zero-copy reshape


def _flash_attention_bhsd(qkv, num_heads, head_dim, scale, mask_i8, causal,
                          tq=512, tk=256):
    """Fallback path: qkv [3, b*nh, s, hd] -> context [b*nh, s, hd]."""
    _, BH, S, HD = qkv.shape
    tq = _pick_tile(S, tq, 8)
    tk = _pick_tile(S, tk, 128)
    has_mask = mask_i8 is not None
    nh = num_heads
    kernel = _make_flash_kernel(scale, tq, tk, causal, has_mask)

    def kv_row(qi, ki):
        if causal:
            return jnp.minimum(ki, (qi * tq + tq - 1) // tk)
        return ki

    in_specs = [
        pl.BlockSpec((None, None, tq, HD), lambda bh, qi, ki: (0, bh, qi, 0)),
        pl.BlockSpec((None, None, tk, HD), lambda bh, qi, ki: (1, bh, kv_row(qi, ki), 0)),
        pl.BlockSpec((None, None, tk, HD), lambda bh, qi, ki: (2, bh, kv_row(qi, ki), 0)),
    ]
    args = [qkv, qkv, qkv]        # same HBM buffer, slicing purely via index_maps
    if has_mask:
        in_specs.append(pl.BlockSpec((None, None, tq, tk),
                                     lambda bh, qi, ki: (bh // nh, 0, qi, ki)))
        args.append(mask_i8)

    return _flash_common(
        S, HD, tq, tk, kernel, in_specs, args,
        jax.ShapeDtypeStruct((BH, S, HD), qkv.dtype),
        pl.BlockSpec((None, tq, HD), lambda bh, qi, ki: (bh, qi, 0)),
        jnp.dtype(qkv.dtype).itemsize, BH, has_mask, BH // nh)


# ----------------------------------------------------------------------------
# Full forward
# ----------------------------------------------------------------------------
def gpt3_parallel_attention_forward(hidden_states, attention_mask, params,
                                    num_heads, head_dim, layer_number,
                                    apply_query_key_layer_scaling=True,
                                    causal_mask=False):
    """hidden_states: [s, b, h]; attention_mask: [b, 1, s, s] bool (True = mask).

    If causal_mask=True the mask is assumed causal and generated in-kernel
    (no mask HBM traffic, above-diagonal kv blocks skipped)."""
    s, b, h = hidden_states.shape
    proj = num_heads * head_dim

    coeff = 1.0
    norm_factor = math.sqrt(head_dim)
    if apply_query_key_layer_scaling:
        coeff = float(max(1, layer_number))
        norm_factor *= coeff
    scale = coeff / norm_factor          # folded baddbmm-alpha * softmax-scale

    # --- QKV projection (ColumnParallelLinear) ---
    x2d = hidden_states.reshape(s * b, h)
    mixed = linear_pallas(x2d, params["w_qkv"], params["b_qkv"])   # [s*b, 3*proj]

    mask_i8 = None
    if not causal_mask:
        mask_i8 = attention_mask.astype(jnp.int8)                  # [b, 1, s, s]

    # --- core attention (flash-style, online softmax) ---
    if head_dim % 128 == 0:
        # Fully fused layout: no wrapper transposes around the flash kernel.
        ctx2d = _flash_attention_fused(mixed, b, s, num_heads, head_dim, scale,
                                       mask_i8, causal_mask)
    else:
        qkv = mixed.reshape(s, b, num_heads, 3, head_dim)
        qkv = jnp.transpose(qkv, (3, 1, 2, 0, 4)).reshape(3, b * num_heads, s,
                                                          head_dim)
        ctx = _flash_attention_bhsd(qkv, num_heads, head_dim, scale,
                                    mask_i8, causal_mask)
        ctx = ctx.reshape(b, num_heads, s, head_dim)
        ctx2d = jnp.transpose(ctx, (2, 0, 1, 3)).reshape(s * b, proj)

    # --- output projection (RowParallelLinear, skip_bias_add=True) ---
    out2d = linear_pallas(ctx2d, params["w_dense"], None)          # [s*b, h]
    return out2d.reshape(s, b, h), params["b_dense"]


# ----------------------------------------------------------------------------
# Pure-JAX reference for the correctness check
# ----------------------------------------------------------------------------
def _reference_forward(hidden_states, attention_mask, params, num_heads,
                       head_dim, layer_number):
    s, b, h = hidden_states.shape
    proj = num_heads * head_dim
    coeff = float(max(1, layer_number))
    norm_factor = math.sqrt(head_dim) * coeff

    hs32 = hidden_states.astype(jnp.float32)
    mixed = hs32 @ params["w_qkv"].astype(jnp.float32).T + params["b_qkv"].astype(jnp.float32)
    mixed = mixed.reshape(s, b, num_heads, 3 * head_dim)
    q, k, v = (mixed[..., :head_dim], mixed[..., head_dim:2 * head_dim],
               mixed[..., 2 * head_dim:])
    qb = jnp.transpose(q, (1, 2, 0, 3))
    kb = jnp.transpose(k, (1, 2, 0, 3))
    vb = jnp.transpose(v, (1, 2, 0, 3))
    scores = jnp.einsum("bnqd,bnkd->bnqk", qb, kb) / norm_factor
    scores = scores.astype(jnp.float32) * coeff
    scores = jnp.where(attention_mask, -10000.0, scores)
    probs = jax.nn.softmax(scores, axis=-1)
    ctx = jnp.einsum("bnqk,bnkd->bnqd", probs, vb)
    ctx = jnp.transpose(ctx, (2, 0, 1, 3)).reshape(s, b, proj)
    out = ctx @ params["w_dense"].astype(jnp.float32).T
    return out, params["b_dense"]


# ----------------------------------------------------------------------------
if __name__ == "__main__":
    def make_inputs(seq, batch, hidden, num_heads, dtype):
        head_dim = hidden // num_heads
        proj = num_heads * head_dim
        key = jax.random.PRNGKey(0)
        k_x, k_wq, k_bq, k_wd, k_bd = jax.random.split(key, 5)
        hs = jax.random.normal(k_x, (seq, batch, hidden), dtype=jnp.float32)
        params = {
            "w_qkv": 0.02 * jax.random.normal(k_wq, (3 * proj, hidden), jnp.float32),
            "b_qkv": 0.02 * jax.random.normal(k_bq, (3 * proj,), jnp.float32),
            "w_dense": 0.02 * jax.random.normal(k_wd, (hidden, proj), jnp.float32),
            "b_dense": 0.02 * jax.random.normal(k_bd, (hidden,), jnp.float32),
        }
        causal = jnp.triu(jnp.ones((seq, seq), dtype=bool), k=1)
        mask = jnp.broadcast_to(causal[None, None], (batch, 1, seq, seq))
        if dtype != jnp.float32:
            hs = hs.astype(dtype)
            params = {n: t.astype(dtype) for n, t in params.items()}
        return hs, mask, params, head_dim

    # --- Case 1: small heads (hd=8) -> fallback (bhsd) layout -----------------
    seq, batch, hidden, nh = 8, 2, 32, 4
    hs, mask, params, hd = make_inputs(seq, batch, hidden, nh, jnp.float32)
    ref_out, ref_bias = _reference_forward(hs, mask, params, nh, hd, 1)

    out, bias = gpt3_parallel_attention_forward(hs, mask, params, nh, hd, 1)
    out = jax.block_until_ready(out)
    bias = jax.block_until_ready(bias)
    assert out.shape == (seq, batch, hidden)
    assert bias.shape == (hidden,)
    assert jnp.allclose(out, ref_out, atol=2e-3, rtol=2e-3)
    assert jnp.allclose(bias, ref_bias)

    # in-kernel causal fast path (no mask DMA, clamped kv index maps)
    out_c, _ = gpt3_parallel_attention_forward(hs, mask, params, nh, hd, 1,
                                               causal_mask=True)
    out_c = jax.block_until_ready(out_c)
    assert jnp.allclose(out_c, ref_out, atol=2e-3, rtol=2e-3)

    # bf16 activations/weights
    hs_b, mask_b, params_b, _ = make_inputs(seq, batch, hidden, nh, jnp.bfloat16)
    out_b, _ = gpt3_parallel_attention_forward(hs_b, mask_b, params_b, nh, hd, 1)
    out_b = jax.block_until_ready(out_b)
    rel = (jnp.linalg.norm(out_b.astype(jnp.float32) - ref_out)
           / jnp.linalg.norm(ref_out))
    assert float(rel) < 0.08

    # --- Case 2: hd=128 -> fully fused layout (no wrapper transposes) ---------
    seq2, batch2, hidden2, nh2 = 16, 2, 256, 2
    hs2, mask2, params2, hd2 = make_inputs(seq2, batch2, hidden2, nh2, jnp.float32)
    ref2, _ = _reference_forward(hs2, mask2, params2, nh2, hd2, 3)

    out2, _ = gpt3_parallel_attention_forward(hs2, mask2, params2, nh2, hd2, 3)
    out2 = jax.block_until_ready(out2)
    assert out2.shape == (seq2, batch2, hidden2)
    assert jnp.allclose(out2, ref2, atol=2e-3, rtol=2e-3)

    out2c, _ = gpt3_parallel_attention_forward(hs2, mask2, params2, nh2, hd2, 3,
                                               causal_mask=True)
    out2c = jax.block_until_ready(out2c)
    assert jnp.allclose(out2c, ref2, atol=2e-3, rtol=2e-3)

    print("KERNEL_OK")
</pallas_src>

<mosaic_0001>
module attributes {stable_mosaic.version = 11 : i64} {
  func.func @kernel(%arg0: i32, %arg1: i32, %arg2: i32, %arg3: memref<16x32xf32, #tpu.memory_space<vmem>>, %arg4: memref<96x32xf32, #tpu.memory_space<vmem>>, %arg5: memref<1x96xf32, #tpu.memory_space<vmem>>, %arg6: memref<16x96xf32, #tpu.memory_space<vmem>>) attributes {dimension_semantics = [#tpu.dimension_semantics<parallel>, #tpu.dimension_semantics<parallel>, #tpu.dimension_semantics<arbitrary>], iteration_bounds = array<i64: 1, 1, 1>, scalar_prefetch = 0 : i64, scratch_operands = 0 : i64, tpu.core_type = #tpu.core_type<tc>, window_params = [{transform_indices = @transform_0, window_bounds = array<i64: 16, 32>}, {transform_indices = @transform_1, window_bounds = array<i64: 96, 32>}, {transform_indices = @transform_2, window_bounds = array<i64: 1, 96>}, {transform_indices = @transform_3, window_bounds = array<i64: 16, 96>}]} {
    %c0_i32 = arith.constant 0 : i32
    %0 = arith.cmpi eq, %arg2, %c0_i32 : i32
    %1 = arith.extui %0 : i1 to i32
    %c0_i32_0 = arith.constant 0 : i32
    %2 = arith.cmpi ne, %1, %c0_i32_0 : i32
    scf.if %2 {
      %c0_8 = arith.constant 0 : index
      %c0_9 = arith.constant 0 : index
      %9 = vector.load %arg5[%c0_8, %c0_9] : memref<1x96xf32, #tpu.memory_space<vmem>>, vector<1x96xf32>
      %10 = vector.shape_cast %9 : vector<1x96xf32> to vector<1x96xf32>
      %11 = vector.broadcast %10 : vector<1x96xf32> to vector<16x96xf32>
      %c0_10 = arith.constant 0 : index
      %c0_11 = arith.constant 0 : index
      %12 = vector.load %arg6[%c0_10, %c0_11] : memref<16x96xf32, #tpu.memory_space<vmem>>, vector<16x96xf32>
      tpu.vector_store %arg6[%c0_10, %c0_11], %11 {strides = array<i32>} : memref<16x96xf32, #tpu.memory_space<vmem>>, vector<16x96xf32>,
    } else {
    }
    %c0 = arith.constant 0 : index
    %c0_1 = arith.constant 0 : index
    %3 = vector.load %arg6[%c0, %c0_1] : memref<16x96xf32, #tpu.memory_space<vmem>>, vector<16x96xf32>
    %c0_2 = arith.constant 0 : index
    %c0_3 = arith.constant 0 : index
    %4 = vector.load %arg3[%c0_2, %c0_3] : memref<16x32xf32, #tpu.memory_space<vmem>>, vector<16x32xf32>
    %c0_4 = arith.constant 0 : index
    %c0_5 = arith.constant 0 : index
    %5 = vector.load %arg4[%c0_4, %c0_5] : memref<96x32xf32, #tpu.memory_space<vmem>>, vector<96x32xf32>
    %cst = arith.constant dense<0.000000e+00> : vector<16x96xf32>
    %6 = tpu.matmul %4, %5, %cst {dimension_numbers = #tpu.dot_dimension_numbers<[1], [1], [0], [0], [0, 0, 1, 0], [], []>} : vector<16x32xf32>, vector<96x32xf32>, vector<16x96xf32> -> vector<16x96xf32>
    %7 = arith.addf %3, %6 : vector<16x96xf32>
    %c0_6 = arith.constant 0 : index
    %c0_7 = arith.constant 0 : index
    %8 = vector.load %arg6[%c0_6, %c0_7] : memref<16x96xf32, #tpu.memory_space<vmem>>, vector<16x96xf32>
    tpu.vector_store %arg6[%c0_6, %c0_7], %7 {strides = array<i32>} : memref<16x96xf32, #tpu.memory_space<vmem>>, vector<16x96xf32>,
    return
  }
  func.func @transform_0(%arg0: i32, %arg1: i32, %arg2: i32) -> (i32, i32) {
    %c0_i32 = arith.constant 0 : i32
    return %arg0, %arg2 : i32, i32
  }
  func.func @transform_1(%arg0: i32, %arg1: i32, %arg2: i32) -> (i32, i32) {
    %c0_i32 = arith.constant 0 : i32
    return %arg1, %arg2 : i32, i32
  }
  func.func @transform_2(%arg0: i32, %arg1: i32, %arg2: i32) -> (i32, i32) {
    %c0_i32 = arith.constant 0 : i32
    %c0_i32_0 = arith.constant 0 : i32
    return %c0_i32, %arg1 : i32, i32
  }
  func.func @transform_3(%arg0: i32, %arg1: i32, %arg2: i32) -> (i32, i32) {
    %c0_i32 = arith.constant 0 : i32
    return %arg0, %arg1 : i32, i32
  }
}

</mosaic_0001>

<bundles_post_ra>
// kernel: tpu_custom_call.1
= control target key start
LH: loop header
LB: loop body
LE: loop exit
PB: predicated region body
PF: predicated region fallthrough
CT: control target
= control target key end

     0   :  { %vm45_vm0 = vcmask 261120   ;;  %vm26_vm1 = vcmask 785408   ;;  %s366_s0 = inlined_call_operand.vmem [shape: f32[16,32], index: 0, kind: input, shape index: {}]   ;;  %s367_s1 = inlined_call_operand.vmem [shape: f32[96,32], index: 1, kind: input, shape index: {}]   ;;  %s368_s2 = inlined_call_operand.vmem [shape: f32[1,96], index: 2, kind: input, shape index: {}]   ;;  %s369_s3 = inlined_call_operand.hbm [shape: f32[16,96], index: 3, kind: output, shape index: {}]  }
   0x1   :  { %v44_v0 = vld [vmem:[%s367_s1 + $0x58] sm:$0xff]  ;;  %v43_v1 = vld [vmem:[%s367_s1 + $0x50] sm:$0xff]  ;;  %v42_v2 = vld [vmem:[%s367_s1 + $0x48] sm:$0xff] }
   0x2   :  { %213 = vmatprep.subr.msk.mxu0 %vm45_vm0, %v44_v0  ;;  %v31_v3 = vld [vmem:[%s366_s0] sm:$0xff] }
   0x3   :  { %214 = vmatpush3.xpose.msk.msra.mxu0 %vm45_vm0, %v44_v0  ;;  %v184_v4 = vld [vmem:[%s368_s2] ss:$0 sm:$0xff]  ;;  %237 = vmatprep.mubr.msk.f32.mxu0 %vm45_vm0, %v31_v3 }
   0x4   :  { %215 = vmatprep.subr.msk.mxu0 %vm45_vm0, %v43_v1  ;;  %28 = vst.msk [vmem:[#allocation2 + $0x8] sm:$0xff] %vm26_vm1, %v184_v4  ;;  %27 = vst.msk [vmem:[#allocation2] sm:$0xff] %vm26_vm1, %v184_v4 }
   0x5   :  { %8 = vsyncpa [#allocation3], 0  ;;  %v41_v5 = vld [vmem:[%s367_s1 + $0x40] sm:$0xff]  ;;  %v40_v6 = vld [vmem:[%s367_s1 + $0x38] sm:$0xff]  ;;  %s265_s14 = smov [#allocation2]  }
   0x6   :  { %v39_v7 = vld [vmem:[%s367_s1 + $0x30] sm:$0xff]  ;;  %v38_v8 = vld [vmem:[%s367_s1 + $0x28] sm:$0xff]  ;;  %v37_v9 = vld [vmem:[%s367_s1 + $0x20] sm:$0xff]  ;;  %s173_s15 = sshll.u32 %s265_s14, 4  ;;  %s174_s15 = int_to_ptr.vmem [resolvable:$true] %s173_s15 }
   0x7   :  { %216 = vmatpush3.xpose.msk.msra.mxu0 %vm45_vm0, %v43_v1  ;;  %v36_v10 = vld [vmem:[%s367_s1 + $0x18] sm:$0xff]  ;;  %v35_v11 = vld [vmem:[%s367_s1 + $0x10] sm:$0xff]  ;;  %v34_v12 = vld [vmem:[%s367_s1 + $0x8] sm:$0xff]  ;;  %p248_p1 = scmp.lt.s32.totalorder %s174_s15, %s174_s15 }
   0x8   :  { %217 = vmatprep.subr.msk.mxu0 %vm45_vm0, %v42_v2  ;;  %v33_v13 = vld [vmem:[%s367_s1] sm:$0xff]  ;;  %v32_v14 = vld [vmem:[%s366_s0 + $0x8] sm:$0xff]  ;;  %s243_s1 = scalar_lea.vmem %s174_s15, 256 }
   0x9   :  { %p244_p0 = scmp.ne.s32.totalorder %s174_s15, %s243_s1  ;;  %p249_p2 = scmp.lt.s32.totalorder %s243_s1, %s243_s1 }
   0xb   :  { %218 = vmatpush3.xpose.msk.msra.mxu0 %vm45_vm0, %v42_v2  ;;  %v30_v15 = vld [vmem:[#allocation2 + $0x8] sm:$0xff]  ;;  %v29_v17 = vld [vmem:[#allocation2] sm:$0xff]  ;;  %p250_p3 = por %p249_p2, %p248_p1 }
   0xc   :  { %219 = vmatprep.subr.msk.mxu0 %vm45_vm0, %v41_v5 }
   0xd   :  { %p251_p4 = pnand %p250_p3, %p244_p0 }
   0xf   :  { %220 = vmatpush3.xpose.msk.msra.mxu0 %vm45_vm0, %v41_v5 }
  0x10   :  { %221 = vmatprep.subr.msk.mxu0 %vm45_vm0, %v40_v6 }
  0x13   :  { %222 = vmatpush3.xpose.msk.msra.mxu0 %vm45_vm0, %v40_v6 }
  0x14   :  { %223 = vmatprep.subr.msk.mxu0 %vm45_vm0, %v39_v7 }
  0x17   :  { %224 = vmatpush3.xpose.msk.msra.mxu0 %vm45_vm0, %v39_v7 }
  0x18   :  { %225 = vmatprep.subr.msk.mxu0 %vm45_vm0, %v38_v8 }
  0x1b   :  { %226 = vmatpush3.xpose.msk.msra.mxu0 %vm45_vm0, %v38_v8 }
  0x1c   :  { %227 = vmatprep.subr.msk.mxu0 %vm45_vm0, %v37_v9 }
  0x1f   :  { %228 = vmatpush3.xpose.msk.msra.mxu0 %vm45_vm0, %v37_v9 }
  0x20   :  { %229 = vmatprep.subr.msk.mxu0 %vm45_vm0, %v36_v10 }
  0x23   :  { %230 = vmatpush3.xpose.msk.msra.mxu0 %vm45_vm0, %v36_v10 }
  0x24   :  { %231 = vmatprep.subr.msk.mxu0 %vm45_vm0, %v35_v11 }
  0x27   :  { %232 = vmatpush3.xpose.msk.msra.mxu0 %vm45_vm0, %v35_v11 }
  0x28   :  { %233 = vmatprep.subr.msk.mxu0 %vm45_vm0, %v34_v12 }
  0x2b   :  { %234 = vmatpush3.xpose.msk.msra.mxu0 %vm45_vm0, %v34_v12 }
  0x2c   :  { %235 = vmatprep.subr.msk.mxu0 %vm45_vm0, %v33_v13 }
  0x2f   :  { %236 = vmatpush3.xpose.msk.msra.mxu0 %vm45_vm0, %v33_v13 }
  0x32   :  { %238 = vmatmul.mubr.msk.f32.vlgmr.msra.gmra.mxu0 %vm45_vm0, %v32_v14 }
  0xf2   :  { %v239_v16 = vpop.f32.mrf.mxu0 }
  0xf3   :  { %v164_v18 = vadd.f32 %v239_v16, %v30_v15 }
  0xf4   :  { %v154_v19 = vpop.f32.mrf.mxu0 }
  0xf5   :  { %167 = vst.msk [vmem:[#allocation2 + $0x8] sm:$0xff] %vm26_vm1, %v164_v18  ;;  %v163_v20 = vadd.f32 %v154_v19, %v29_v17 }
  0xf7   :  { %166 = vst.msk [vmem:[#allocation2] sm:$0xff] %vm26_vm1, %v163_v20 }
  0xf8   :  { %254 = shalt.err (!%p251_p4)
}
  0xf9   :  { %s266_s0 = smov 128   ;;  %s267_s16 = smov 8  }
  0xfa   :  { %179 = dma.vmem_to_hbm [thread:$0]  %s174_s15, 256, %s369_s3, [#allocation3], %s266_s0, %s266_s0, %s267_s16  }
  0xfb   :  { %263 = dma.done.wait [#allocation3], 256  }
  0xfc   :  { %264 = vsyncadd [#allocation3], 4294967040 }
  0xfd   :  { %183 = vsyncpa [#allocation3], 1 }

</bundles_post_ra>
